<compile_context>
chip_gen: v7x
topology: tpu7x:2x2x1
jax: 0.10.0
libtpu: 0.0.40
codegen_flags: <defaults>
</compile_context>

<pallas_src>
import jax
import jax.numpy as jnp
from jax.experimental import pallas as pl
from jax.experimental.pallas import tpu as pltpu


def _round_up(n, m):
    return ((n + m - 1) // m) * m


def _pad2(a, rows, cols):
    pr, pc = rows - a.shape[0], cols - a.shape[1]
    if pr == 0 and pc == 0:
        return a
    return jnp.pad(a, ((0, pr), (0, pc)))


def _pick_tile(dim, cap):
    """Largest multiple of 128 that divides `dim` and is <= min(cap, dim).

    `dim` and `cap` are multiples of 128, so this terminates at >= 128.
    """
    t = min(cap, dim)
    while dim % t:
        t -= 128
    return t


def _vmem_capacity_bytes():
    try:
        return int(pltpu.get_tpu_info().vmem_capacity_bytes)
    except Exception:
        return 64 * 1024 * 1024  # conservative fallback (v7x per-TC VMEM)


# Whole-problem-in-VMEM threshold (bytes, counted at 4 B/elt upper bound).
_SINGLE_BLOCK_BYTES = 4 * 1024 * 1024


def _tiled_kernel(x_ref, w_ref, b_ref, xt_ref, o_ref):
    # Output block (index_map (i, j)) is VMEM-resident across the whole K
    # reduction: seed it with residual + bias once, then accumulate the matmul
    # directly into it. No scratch accumulator, no finalize pass.
    @pl.when(pl.program_id(2) == 0)
    def _seed():
        o_ref[...] = xt_ref[...] + b_ref[...]

    o_ref[...] += jnp.dot(x_ref[...], w_ref[...],
                          preferred_element_type=jnp.float32)


def _single_block_kernel(x_ref, w_ref, b_ref, xt_ref, o_ref):
    o_ref[...] = (jnp.dot(x_ref[...], w_ref[...],
                          preferred_element_type=jnp.float32)
                  + b_ref[...] + xt_ref[...])


def residual_layer(x, weights, bias, *, compute_dtype=jnp.float32):
    """x: (M, size_in); weights: (size_out, size_in); bias: (size_out,)."""
    M, size_in = x.shape
    size_out, size_in_w = weights.shape
    assert size_in_w == size_in
    assert bias.shape == (size_out,)

    f32 = jnp.float32
    x_f32 = x.astype(f32)

    # Residual term with the torch narrow / right-zero-pad semantics, shaped
    # (M, size_out) so it tiles exactly like the output (decoupled from K).
    if size_in >= size_out:
        xt = x_f32[:, :size_out]
    else:
        xt = jnp.pad(x_f32, ((0, 0), (0, size_out - size_in)))

    x_mm = x_f32.astype(compute_dtype)
    w_t = weights.T.astype(compute_dtype)          # one wrapper-side transpose
    b = bias.astype(f32).reshape(1, size_out)

    Kp = _round_up(size_in, 128)
    Np = _round_up(size_out, 128)

    # ---------- tiny problems: one block, whole operands in VMEM ----------
    Mp8 = _round_up(M, 8)
    small_bytes = 4 * (Mp8 * Kp + Kp * Np + 2 * Mp8 * Np + Np)
    if small_bytes <= _SINGLE_BLOCK_BYTES:
        xp = _pad2(x_mm, Mp8, Kp)
        wp = _pad2(w_t, Kp, Np)
        bp = _pad2(b, 1, Np)
        xtp = _pad2(xt, Mp8, Np)

        out = pl.pallas_call(
            _single_block_kernel,
            out_shape=jax.ShapeDtypeStruct((Mp8, Np), f32),
            grid=(1,),
            in_specs=[
                pl.BlockSpec((Mp8, Kp), lambda i: (0, 0)),
                pl.BlockSpec((Kp, Np), lambda i: (0, 0)),
                pl.BlockSpec((1, Np), lambda i: (0, 0)),
                pl.BlockSpec((Mp8, Np), lambda i: (0, 0)),
            ],
            out_specs=pl.BlockSpec((Mp8, Np), lambda i: (0, 0)),
            compiler_params=pltpu.CompilerParams(
                dimension_semantics=("arbitrary",),
                vmem_limit_bytes=16 * 1024 * 1024),
        )(xp, wp, bp, xtp)
        return out[:M, :size_out]

    # ---------------- tiled path: (M, N, K) grid, K last ------------------
    big_vmem = _vmem_capacity_bytes() >= 100 * 1024 * 1024  # v5e/v6e: 128 MiB
    m_cap = 1024 if big_vmem else 512
    n_cap = 1024 if big_vmem else 512
    k_cap = 512

    tile_m = _pick_tile(_round_up(M, 128), m_cap)   # never below 128
    tile_n = _pick_tile(Np, n_cap)
    tile_k = _pick_tile(Kp, k_cap)
    Mp = _round_up(M, tile_m)

    xp = _pad2(x_mm, Mp, Kp)
    wp = _pad2(w_t, Kp, Np)
    bp = _pad2(b, 1, Np)
    xtp = _pad2(xt, Mp, Np)

    itemsize = jnp.dtype(compute_dtype).itemsize
    footprint = 2 * (tile_m * tile_k * itemsize      # x       (double-buffered)
                     + tile_k * tile_n * itemsize    # W^T
                     + tile_m * tile_n * 4           # residual
                     + tile_n * 4                    # bias
                     + tile_m * tile_n * 4)          # out
    vmem_limit = max(16 * 1024 * 1024, footprint + 8 * 1024 * 1024)

    grid = (Mp // tile_m, Np // tile_n, Kp // tile_k)

    out = pl.pallas_call(
        _tiled_kernel,
        out_shape=jax.ShapeDtypeStruct((Mp, Np), f32),
        grid=grid,
        in_specs=[
            pl.BlockSpec((tile_m, tile_k), lambda i, j, k: (i, k)),   # x
            pl.BlockSpec((tile_k, tile_n), lambda i, j, k: (k, j)),   # W^T
            pl.BlockSpec((1, tile_n), lambda i, j, k: (0, j)),        # bias
            pl.BlockSpec((tile_m, tile_n), lambda i, j, k: (i, j)),   # residual
        ],
        out_specs=pl.BlockSpec((tile_m, tile_n), lambda i, j, k: (i, j)),
        compiler_params=pltpu.CompilerParams(
            dimension_semantics=("parallel", "parallel", "arbitrary"),
            vmem_limit_bytes=vmem_limit),
    )(xp, wp, bp, xtp)

    return out[:M, :size_out]


def _reference(x, weights, bias):
    size_in = x.shape[-1]
    size_out = weights.shape[0]
    if size_in > size_out:
        xt = x[:, :size_out]
    elif size_in < size_out:
        xt = jnp.pad(x, ((0, 0), (0, size_out - size_in)))
    else:
        xt = x
    mm = jnp.dot(x, weights.T, precision=jax.lax.Precision.HIGHEST)
    return mm + bias[None, :] + xt


if __name__ == "__main__":
    key = jax.random.PRNGKey(0)

    # (M, size_in, size_out): identity / narrow / zero-pad residual branches;
    # the last two are big enough to exercise the tiled (M, N, K) grid path.
    cases = [
        (16, 128, 128),    # identity residual             (single-block path)
        (32, 256, 128),    # narrow residual               (single-block path)
        (8, 96, 160),      # zero-pad residual, unaligned  (single-block path)
        (768, 640, 512),   # narrow residual               (tiled grid path)
        (768, 512, 640),   # zero-pad residual             (tiled grid path)
    ]

    for idx, (M, size_in, size_out) in enumerate(cases):
        kx, kw, kb = jax.random.split(jax.random.fold_in(key, idx), 3)
        x = jax.random.normal(kx, (M, size_in), dtype=jnp.float32)
        weights = jax.random.normal(kw, (size_out, size_in), dtype=jnp.float32) * 0.1
        bias = jax.random.normal(kb, (size_out,), dtype=jnp.float32) * 0.1

        out = jax.block_until_ready(residual_layer(x, weights, bias))
        ref = _reference(x, weights, bias)

        assert out.shape == ref.shape, f"shape mismatch in case {idx}"
        assert jnp.allclose(out, ref, atol=1e-3, rtol=1e-3), \
            f"mismatch vs reference in case {idx}"

    print("KERNEL_OK")
</pallas_src>

<mosaic_0001>
module attributes {stable_mosaic.version = 11 : i64} {
  func.func @_single_block_kernel(%arg0: i32, %arg1: memref<16x128xf32, #tpu.memory_space<vmem>>, %arg2: memref<128x128xf32, #tpu.memory_space<vmem>>, %arg3: memref<1x128xf32, #tpu.memory_space<vmem>>, %arg4: memref<16x128xf32, #tpu.memory_space<vmem>>, %arg5: memref<16x128xf32, #tpu.memory_space<vmem>>) attributes {dimension_semantics = [#tpu.dimension_semantics<arbitrary>], iteration_bounds = array<i64: 1>, scalar_prefetch = 0 : i64, scratch_operands = 0 : i64, tpu.core_type = #tpu.core_type<tc>, window_params = [{pipeline_mode = #tpu.pipeline_mode<synchronous>, transform_indices = @transform_0, window_bounds = array<i64: 16, 128>}, {pipeline_mode = #tpu.pipeline_mode<synchronous>, transform_indices = @transform_1, window_bounds = array<i64: 128, 128>}, {pipeline_mode = #tpu.pipeline_mode<synchronous>, transform_indices = @transform_2, window_bounds = array<i64: 1, 128>}, {pipeline_mode = #tpu.pipeline_mode<synchronous>, transform_indices = @transform_3, window_bounds = array<i64: 16, 128>}, {pipeline_mode = #tpu.pipeline_mode<synchronous>, transform_indices = @transform_4, window_bounds = array<i64: 16, 128>}]} {
    %c0 = arith.constant 0 : index
    %c0_0 = arith.constant 0 : index
    %0 = vector.load %arg1[%c0, %c0_0] : memref<16x128xf32, #tpu.memory_space<vmem>>, vector<16x128xf32>
    %c0_1 = arith.constant 0 : index
    %c0_2 = arith.constant 0 : index
    %1 = vector.load %arg2[%c0_1, %c0_2] : memref<128x128xf32, #tpu.memory_space<vmem>>, vector<128x128xf32>
    %cst = arith.constant dense<0.000000e+00> : vector<16x128xf32>
    %2 = tpu.matmul %0, %1, %cst {dimension_numbers = #tpu.dot_dimension_numbers<[1], [0], [0], [1], [0, 0, 1, 1], [], []>} : vector<16x128xf32>, vector<128x128xf32>, vector<16x128xf32> -> vector<16x128xf32>
    %c0_3 = arith.constant 0 : index
    %c0_4 = arith.constant 0 : index
    %3 = vector.load %arg3[%c0_3, %c0_4] : memref<1x128xf32, #tpu.memory_space<vmem>>, vector<1x128xf32>
    %4 = vector.broadcast %3 : vector<1x128xf32> to vector<16x128xf32>
    %5 = arith.addf %2, %4 : vector<16x128xf32>
    %c0_5 = arith.constant 0 : index
    %c0_6 = arith.constant 0 : index
    %6 = vector.load %arg4[%c0_5, %c0_6] : memref<16x128xf32, #tpu.memory_space<vmem>>, vector<16x128xf32>
    %7 = arith.addf %5, %6 : vector<16x128xf32>
    %c0_7 = arith.constant 0 : index
    %c0_8 = arith.constant 0 : index
    %8 = vector.load %arg5[%c0_7, %c0_8] : memref<16x128xf32, #tpu.memory_space<vmem>>, vector<16x128xf32>
    tpu.vector_store %arg5[%c0_7, %c0_8], %7 {strides = array<i32>} : memref<16x128xf32, #tpu.memory_space<vmem>>, vector<16x128xf32>,
    return
  }
  func.func @transform_0(%arg0: i32) -> (i32, i32) {
    %c0_i32 = arith.constant 0 : i32
    %c0_i32_0 = arith.constant 0 : i32
    %c0_i32_1 = arith.constant 0 : i32
    return %c0_i32, %c0_i32_0 : i32, i32
  }
  func.func @transform_1(%arg0: i32) -> (i32, i32) {
    %c0_i32 = arith.constant 0 : i32
    %c0_i32_0 = arith.constant 0 : i32
    %c0_i32_1 = arith.constant 0 : i32
    return %c0_i32, %c0_i32_0 : i32, i32
  }
  func.func @transform_2(%arg0: i32) -> (i32, i32) {
    %c0_i32 = arith.constant 0 : i32
    %c0_i32_0 = arith.constant 0 : i32
    %c0_i32_1 = arith.constant 0 : i32
    return %c0_i32, %c0_i32_0 : i32, i32
  }
  func.func @transform_3(%arg0: i32) -> (i32, i32) {
    %c0_i32 = arith.constant 0 : i32
    %c0_i32_0 = arith.constant 0 : i32
    %c0_i32_1 = arith.constant 0 : i32
    return %c0_i32, %c0_i32_0 : i32, i32
  }
  func.func @transform_4(%arg0: i32) -> (i32, i32) {
    %c0_i32 = arith.constant 0 : i32
    %c0_i32_0 = arith.constant 0 : i32
    %c0_i32_1 = arith.constant 0 : i32
    return %c0_i32, %c0_i32_0 : i32, i32
  }
}

</mosaic_0001>

<bundles_post_ra>
// kernel: tpu_custom_call.1
= control target key start
LH: loop header
LB: loop body
LE: loop exit
PB: predicated region body
PF: predicated region fallthrough
CT: control target
= control target key end

     0   :  { %9 = vsyncpa [#allocation3], 0  ;;  %s470_s0 = inlined_call_operand.hbm [shape: f32[16,128], index: 0, kind: input, shape index: {}]   ;;  %s471_s1 = inlined_call_operand.hbm [shape: f32[128,128], index: 1, kind: input, shape index: {}]   ;;  %s472_s2 = inlined_call_operand.vmem [shape: f32[1,128], index: 2, kind: input, shape index: {}]   ;;  %s473_s3 = inlined_call_operand.hbm [shape: f32[16,128], index: 3, kind: input, shape index: {}]   ;;  %s474_s4 = inlined_call_operand.hbm [shape: f32[16,128], index: 4, kind: output, shape index: {}]  }
   0x1   :  { %10 = vsyncpa [#allocation6], 0 }
   0x2   :  { %11 = vsyncpa [#allocation4], 0  ;;  %s369_s15 = smov [#allocation5]   ;;  %s370_s17 = smov [#allocation2]  }
   0x3   :  { %s29_s16 = sshll.u32 %s369_s15, 4  ;;  %s17_s18 = sshll.u32 %s370_s17, 4  ;;  %s30_s16 = int_to_ptr.vmem [resolvable:$true] %s29_s16  ;;  %s400_s18 = int_to_ptr.vmem [resolvable:$true] %s17_s18 }
   0x4   :  { %s275_s21 = scalar_lea.hbm %s471_s1, 2048 }
   0x5   :  { %p276_p0 = scmp.ne.s32.totalorder %s471_s1, %s275_s21  ;;  %p279_p1 = scmp.lt.u32.totalorder %s275_s21, %s471_s1 }
   0x7   :  { %p281_p2 = pnand %p279_p1, %p276_p0 }
   0x9   :  { %284 = shalt.err (!%p281_p2)
}
   0xa   :  { %s285_s26 = scalar_lea.vmem %s30_s16, 2048  ;;  %p290_p4 = scmp.lt.s32.totalorder %s30_s16, %s30_s16 }
   0xb   :  { %p286_p3 = scmp.ne.s32.totalorder %s30_s16, %s285_s26  ;;  %p291_p5 = scmp.lt.s32.totalorder %s285_s26, %s285_s26 }
   0xd   :  { %p292_p6 = por %p291_p5, %p290_p4 }
   0xf   :  { %p293_p7 = pnand %p292_p6, %p286_p3 }
  0x11   :  { %296 = shalt.err (!%p293_p7)
}
  0x12   :  { %s371_s27 = smov 128   ;;  %s372_s28 = smov 8  }
  0x13   :  { %35 = dma.hbm_to_vmem [thread:$0]  %s471_s1, 2048, %s30_s16, [#allocation6], %s371_s27, %s371_s27, %s372_s28  }
  0x14   :  { %s297_s7 = scalar_lea.hbm %s470_s0, 256 }
  0x15   :  { %p298_p8 = scmp.ne.s32.totalorder %s470_s0, %s297_s7  ;;  %p301_p9 = scmp.lt.u32.totalorder %s297_s7, %s470_s0 }
  0x17   :  { %p303_p10 = pnand %p301_p9, %p298_p8 }
  0x19   :  { %306 = shalt.err (!%p303_p10)
}
  0x1a   :  { %s307_s12 = scalar_lea.vmem %s400_s18, 256  ;;  %p312_p12 = scmp.lt.s32.totalorder %s400_s18, %s400_s18 }
  0x1b   :  { %p308_p11 = scmp.ne.s32.totalorder %s400_s18, %s307_s12  ;;  %p313_p13 = scmp.lt.s32.totalorder %s307_s12, %s307_s12 }
  0x1d   :  { %p314_p0 = por %p313_p13, %p312_p12 }
  0x1f   :  { %p315_p1 = pnand %p314_p0, %p308_p11 }
  0x21   :  { %318 = shalt.err (!%p315_p1)
}
  0x22   :  { %23 = dma.hbm_to_vmem [thread:$0]  %s470_s0, 256, %s400_s18, [#allocation3], %s371_s27, %s371_s27, %s372_s28  }
  0x23   :  { %s373_s14 = smov [#allocation7]   ;;  %s319_s19 = scalar_lea.hbm %s473_s3, 256 }
  0x24   :  { %s43_s15 = sshll.u32 %s373_s14, 4  ;;  %p320_p2 = scmp.ne.s32.totalorder %s473_s3, %s319_s19  ;;  %s44_s15 = int_to_ptr.vmem [resolvable:$true] %s43_s15 }
  0x25   :  { %p323_p3 = scmp.lt.u32.totalorder %s319_s19, %s473_s3 }
  0x27   :  { %p325_p4 = pnand %p323_p3, %p320_p2 }
  0x29   :  { %328 = shalt.err (!%p325_p4)
}
  0x2a   :  { %s329_s24 = scalar_lea.vmem %s44_s15, 256  ;;  %p334_p6 = scmp.lt.s32.totalorder %s44_s15, %s44_s15 }
  0x2b   :  { %p330_p5 = scmp.ne.s32.totalorder %s44_s15, %s329_s24  ;;  %p335_p7 = scmp.lt.s32.totalorder %s329_s24, %s329_s24 }
  0x2d   :  { %p336_p8 = por %p335_p7, %p334_p6 }
  0x2f   :  { %p337_p9 = pnand %p336_p8, %p330_p5 }
  0x31   :  { %340 = shalt.err (!%p337_p9)
}
  0x32   :  { %49 = dma.hbm_to_vmem [thread:$0]  %s473_s3, 256, %s44_s15, [#allocation6], %s371_s27, %s371_s27, %s372_s28  }
  0x33   :  { %363 = dma.done.wait [#allocation3], 256  }
  0x34   :  { %364 = vsyncadd [#allocation3], 4294967040 }
  0x35   :  { %365 = dma.done.wait [#allocation6], 2304  }
  0x36   :  { %366 = vsyncadd [#allocation6], 4294964992  ;;  %v61_v0 = vld [vmem:[#allocation5] sm:$0xff]  ;;  %v62_v1 = vld [vmem:[#allocation5 + $0x8] sm:$0xff]  ;;  %s374_s26 = smov [#allocation8]  }
  0x37   :  { %v63_v2 = vld [vmem:[#allocation5 + $0x10] sm:$0xff]  ;;  %v237_v3 = vpack.c.bf16 %v62_v1, %v61_v0  ;;  %v64_v4 = vld [vmem:[#allocation5 + $0x18] sm:$0xff]  ;;  %v65_v6 = vld [vmem:[#allocation5 + $0x20] sm:$0xff]  ;;  %s170_s29 = sshll.u32 %s374_s26, 4  ;;  %s171_s29 = int_to_ptr.vmem [resolvable:$true] %s170_s29 }
  0x38   :  { %v241_v5 = vpack.c.bf16 %v64_v4, %v63_v2  ;;  %v66_v7 = vld [vmem:[#allocation5 + $0x28] sm:$0xff]  ;;  %v59_v9 = vld [vmem:[#allocation2] sm:$0xff]  ;;  %v68_v11 = vld [vmem:[#allocation5 + $0x38] sm:$0xff]  ;;  %s341_s30 = scalar_lea.vmem %s171_s29, 256  ;;  %p346_p11 = scmp.lt.s32.totalorder %s171_s29, %s171_s29 }
  0x39   :  { %238 = vmatprep.subr.bf16.mxu0 %v237_v3  ;;  %v245_v8 = vpack.c.bf16 %v66_v7, %v65_v6  ;;  %v67_v10 = vld [vmem:[#allocation5 + $0x30] sm:$0xff]  ;;  %234 = vmatprep.mubr.f32.mxu0 %v59_v9  ;;  %v69_v13 = vld [vmem:[#allocation5 + $0x40] sm:$0xff]  ;;  %v70_v14 = vld [vmem:[#allocation5 + $0x48] sm:$0xff]  ;;  %p342_p10 = scmp.ne.s32.totalorder %s171_s29, %s341_s30  ;;  %p347_p12 = scmp.lt.s32.totalorder %s341_s30, %s341_s30 }
  0x3a   :  { %240 = vmatpush3.bf16.msra.mxu0 %v237_v3  ;;  %v249_v12 = vpack.c.bf16 %v68_v11, %v67_v10  ;;  %v253_v15 = vpack.c.bf16 %v70_v14, %v69_v13  ;;  %v71_v16 = vld [vmem:[#allocation5 + $0x50] sm:$0xff]  ;;  %v72_v17 = vld [vmem:[#allocation5 + $0x58] sm:$0xff]  ;;  %v73_v19 = vld [vmem:[#allocation5 + $0x60] sm:$0xff] }
  0x3b   :  { %242 = vmatprep.subr.bf16.mxu0 %v241_v5  ;;  %v257_v18 = vpack.c.bf16 %v72_v17, %v71_v16  ;;  %v74_v20 = vld [vmem:[#allocation5 + $0x68] sm:$0xff]  ;;  %v75_v22 = vld [vmem:[#allocation5 + $0x70] sm:$0xff]  ;;  %v76_v23 = vld [vmem:[#allocation5 + $0x78] sm:$0xff]  ;;  %p348_p13 = por %p347_p12, %p346_p11 }
  0x3c   :  { %v261_v21 = vpack.c.bf16 %v74_v20, %v73_v19  ;;  %v265_v24 = vpack.c.bf16 %v76_v23, %v75_v22  ;;  %v60_v25 = vld [vmem:[#allocation2 + $0x8] sm:$0xff]  ;;  %v183_v26 = vld [vmem:[%s472_s2] ss:$0 sm:$0xff]  ;;  %v160_v28 = vld [vmem:[#allocation7 + $0x8] sm:$0xff] }
  0x3d   :  { %v159_v31 = vld [vmem:[#allocation7] sm:$0xff]  ;;  %p349_p0 = pnand %p348_p13, %p342_p10 }
  0x3e   :  { %244 = vmatpush3.bf16.msra.mxu0 %v241_v5 }
  0x3f   :  { %246 = vmatprep.subr.bf16.mxu0 %v245_v8 }
  0x42   :  { %248 = vmatpush3.bf16.msra.mxu0 %v245_v8 }
  0x43   :  { %250 = vmatprep.subr.bf16.mxu0 %v249_v12 }
  0x46   :  { %252 = vmatpush3.bf16.msra.mxu0 %v249_v12 }
  0x47   :  { %254 = vmatprep.subr.bf16.mxu0 %v253_v15 }
  0x4a   :  { %256 = vmatpush3.bf16.msra.mxu0 %v253_v15 }
  0x4b   :  { %258 = vmatprep.subr.bf16.mxu0 %v257_v18 }
  0x4e   :  { %260 = vmatpush3.bf16.msra.mxu0 %v257_v18 }
  0x4f   :  { %262 = vmatprep.subr.bf16.mxu0 %v261_v21 }
  0x52   :  { %264 = vmatpush3.bf16.msra.mxu0 %v261_v21 }
  0x53   :  { %266 = vmatprep.subr.bf16.mxu0 %v265_v24 }
  0x56   :  { %268 = vmatpush3.bf16.msra.mxu0 %v265_v24 }
  0x59   :  { %235 = vmatmul.mubr.f32.vlgmr.msra.gmra.mrb[0].mxu0 %v60_v25 }
 0x12c   :  { %v236_v27 = vpop.f32.mrb[0].mxu0 }
 0x12d   :  { %v156_v29 = vadd.f32 %v236_v27, %v183_v26  ;;  %v150_v30 = vpop.f32.mrb[1].mxu0 }
 0x12e   :  { %v151_v32 = vadd.f32 %v183_v26, %v150_v30 }
 0x12f   :  { %v162_v33 = vadd.f32 %v160_v28, %v156_v29 }
 0x130   :  { %v161_v34 = vadd.f32 %v159_v31, %v151_v32 }
 0x131   :  { %164 = vst [vmem:[#allocation8 + $0x8] sm:$0xff] %v162_v33 }
 0x132   :  { %163 = vst [vmem:[#allocation8] sm:$0xff] %v161_v34 }
 0x133   :  { %352 = shalt.err (!%p349_p0)
}
 0x134   :  { %s353_s6 = scalar_lea.hbm %s474_s4, 256 }
 0x135   :  { %p354_p1 = scmp.ne.s32.totalorder %s474_s4, %s353_s6  ;;  %p357_p2 = scmp.lt.u32.totalorder %s353_s6, %s474_s4 }
 0x137   :  { %p359_p3 = pnand %p357_p2, %p354_p1 }
 0x139   :  { %362 = shalt.err (!%p359_p3)
}
 0x13a   :  { %176 = dma.vmem_to_hbm [thread:$0]  %s171_s29, 256, %s474_s4, [#allocation4], %s371_s27, %s371_s27, %s372_s28  }
 0x13b   :  { %367 = dma.done.wait [#allocation4], 256  }
 0x13c   :  { %368 = vsyncadd [#allocation4], 4294967040 }
 0x13d   :  { %180 = vsyncpa [#allocation3], 1 }
 0x13e   :  { %181 = vsyncpa [#allocation6], 1 }
 0x13f   :  { %182 = vsyncpa [#allocation4], 1 }

</bundles_post_ra>
